<compile_context>
chip_gen: v6e
topology: v6e:2x2x1
jax: 0.10.0
libtpu: 0.0.40
codegen_flags: <defaults>
</compile_context>

<pallas_src>
import functools

import jax
import jax.numpy as jnp
from jax.experimental import pallas as pl
from jax.experimental.pallas import tpu as pltpu

LANES = 128
SUBLANES = 8


def _round_up(x, m):
    return -(-x // m) * m


def _pick_batch_tile(batch_padded):
    """Per-generation batch tile (rows per grid step)."""
    try:
        kind = jax.devices()[0].device_kind.lower()
    except Exception:  # pragma: no cover - defensive
        kind = ""
    if ("v5" in kind) or ("v6" in kind):
        # 128 MiB VMEM: big tiles amortize the ~0.35 us per-grid-step overhead.
        return 512
    # v7x-class: halved VMEM + 2 TensorCores -> smaller tiles and aim for
    # >= 2 grid steps so the "parallel" batch axis shards across both TCs.
    return min(256, max(SUBLANES, _round_up(batch_padded, 2 * SUBLANES) // 2))


def _cnn_kernel(emb_ref, conv_w_ref, conv_b_ref, fc_w_ref, fc_b_ref, out_ref,
                *, window, valid_len):
    # emb_ref:    (TB, Sp, Ep) bf16  gathered, lane-padded embeddings
    # conv_w_ref: (W*Ep, Cp)   bf16  im2col conv weight (E, C zero-padded)
    # conv_b_ref: (1, Cp)      f32
    # fc_w_ref:   (Cp, Op)     bf16
    # fc_b_ref:   (1, Op)      f32
    # out_ref:    (TB, Op)     f32
    TB, Sp, Ep = emb_ref.shape
    Cp = conv_w_ref.shape[1]
    M = TB * Sp

    # Widen once to f32 so every reshape / sublane rotation stays on the
    # native (8,128) f32 tiling (Sp multiple of 8, Ep multiple of 128 ->
    # no relayout copies).
    emb = emb_ref[...].astype(jnp.float32).reshape(M, Ep)

    # im2col over ALL Sp positions via XLU sublane rotations (rides the
    # otherwise-idle XLU slot; no misaligned slices).  Rows that wrap past a
    # batch row sit at positions >= valid_len and are masked before the max.
    shifted = [emb]
    for w in range(1, window):
        shifted.append(pltpu.roll(emb, shift=M - w, axis=0))
    cols = jnp.concatenate(shifted, axis=1)                    # (M, W*Ep) f32

    # Conv2d(1, C, (W, E)) as ONE im2col matmul: bf16 operands, f32 accum.
    feat = jnp.dot(cols.astype(jnp.bfloat16), conv_w_ref[...],
                   preferred_element_type=jnp.float32)         # (M, Cp)
    feat = jnp.maximum(feat + conv_b_ref[...], 0.0)            # bias + ReLU (f32)
    feat = feat.reshape(TB, Sp, Cp)

    # Max-pool over the valid window positions.  ReLU output is >= 0 and
    # valid_len >= 1, so masking the invalid tail to 0 keeps the max exact.
    pos = jax.lax.broadcasted_iota(jnp.int32, feat.shape, 1)
    pooled = jnp.max(jnp.where(pos < valid_len, feat, 0.0), axis=1)  # (TB, Cp)

    # TODO(synk): nn.Dropout is identity in eval mode; train-mode dropout
    # (PRNG mask + 1/(1-p) scaling) is not implemented.

    logits = jnp.dot(pooled.astype(jnp.bfloat16), fc_w_ref[...],
                     preferred_element_type=jnp.float32) + fc_b_ref[...]
    out_ref[...] = logits.astype(out_ref.dtype)


def cnn_forward(token_ids, emb_table, conv_w, conv_b, fc_w, fc_b,
                *, batch_tile=None):
    """token_ids: int [B, S]; torch-layout params; returns f32 logits [B, O]."""
    B, S = token_ids.shape
    V, E = emb_table.shape
    C, _, W, E2 = conv_w.shape
    O = fc_w.shape[0]
    assert E2 == E and fc_w.shape[1] == C
    L = S - W + 1
    assert L >= 1, "sequence length must be >= window size"

    Ep = _round_up(E, LANES)
    Cp = _round_up(C, LANES)
    Op = _round_up(O, LANES)
    Sp = _round_up(S, SUBLANES)

    # ---- batch tiling (per-generation default) -----------------------------
    Bp = _round_up(B, SUBLANES)
    if batch_tile is None:
        batch_tile = _pick_batch_tile(Bp)
    TB = min(_round_up(batch_tile, SUBLANES), Bp)
    Bp = _round_up(Bp, TB)
    grid = (Bp // TB,)

    # ---- embedding gather in plain JAX (scales to any vocab size) ----------
    # Lane-pad + bf16-cast the table BEFORE the lookup so the padded bf16
    # activation comes straight out of the gather (half the read traffic,
    # no extra pad pass over the [B,S,E] tensor).  Padded batch rows use
    # token 0 and are sliced off; padded seq positions are masked in-kernel.
    table = jnp.pad(emb_table, ((0, 0), (0, Ep - E))).astype(jnp.bfloat16)
    ids = jnp.pad(token_ids.astype(jnp.int32), ((0, Bp - B), (0, Sp - S)))
    emb = table[ids]                                       # (Bp, Sp, Ep) bf16

    # ---- weight prep: torch layout -> lane-padded bf16 MXU layout ----------
    # conv: [C,1,W,E] -> [W,E,C] -> pad (E->Ep, C->Cp) -> [W*Ep, Cp]
    w3 = jnp.transpose(conv_w[:, 0, :, :], (1, 2, 0))
    w3 = jnp.pad(w3, ((0, 0), (0, Ep - E), (0, Cp - C)))
    conv_w_flat = w3.reshape(W * Ep, Cp).astype(jnp.bfloat16)
    conv_b_p = jnp.pad(conv_b, (0, Cp - C)).reshape(1, Cp).astype(jnp.float32)
    fc_w_p = jnp.pad(fc_w.T, ((0, Cp - C), (0, Op - O))).astype(jnp.bfloat16)
    fc_b_p = jnp.pad(fc_b, (0, Op - O)).reshape(1, Op).astype(jnp.float32)

    # ---- VMEM budget (inputs x2 pipeline buffers + kernel temporaries) -----
    bytes_io = 2 * (TB * Sp * Ep * 2 + W * Ep * Cp * 2 + Cp * 4
                    + Cp * Op * 2 + Op * 4 + TB * Op * 4)
    bytes_tmp = (TB * Sp * Ep * 4 + TB * Sp * W * Ep * 6
                 + 2 * TB * Sp * Cp * 4 + TB * Cp * 6 + TB * Op * 4)
    vmem_limit = int(min(max(1.5 * (bytes_io + bytes_tmp), 32 << 20), 64 << 20))

    flops = 2.0 * Bp * Sp * (W * Ep) * Cp + 2.0 * Bp * Cp * Op
    bytes_accessed = (emb.size * 2 + conv_w_flat.size * 2 + conv_b_p.size * 4
                      + fc_w_p.size * 2 + fc_b_p.size * 4 + Bp * Op * 4)
    cost = pl.CostEstimate(flops=int(flops), transcendentals=0,
                           bytes_accessed=int(bytes_accessed))

    kernel = functools.partial(_cnn_kernel, window=W, valid_len=L)

    out = pl.pallas_call(
        kernel,
        out_shape=jax.ShapeDtypeStruct((Bp, Op), jnp.float32),
        grid_spec=pltpu.PrefetchScalarGridSpec(
            num_scalar_prefetch=0,
            grid=grid,
            in_specs=[
                pl.BlockSpec((TB, Sp, Ep), lambda b: (b, 0, 0)),   # embeddings
                pl.BlockSpec((W * Ep, Cp), lambda b: (0, 0)),      # conv weight
                pl.BlockSpec((1, Cp), lambda b: (0, 0)),           # conv bias
                pl.BlockSpec((Cp, Op), lambda b: (0, 0)),          # fc weight
                pl.BlockSpec((1, Op), lambda b: (0, 0)),           # fc bias
            ],
            out_specs=pl.BlockSpec((TB, Op), lambda b: (b, 0)),
        ),
        compiler_params=pltpu.CompilerParams(
            dimension_semantics=("parallel",),
            vmem_limit_bytes=vmem_limit,
        ),
        cost_estimate=cost,
    )(emb, conv_w_flat, conv_b_p, fc_w_p, fc_b_p)

    return out[:B, :O]


def cnn_reference(token_ids, emb_table, conv_w, conv_b, fc_w, fc_b):
    """Pure-JAX f32 reference matching the PyTorch eval-mode forward."""
    emb = emb_table[token_ids]                                  # (B, S, E)
    B, S, E = emb.shape
    C, _, W, _ = conv_w.shape
    L = S - W + 1
    fm = jnp.stack(
        [jnp.einsum("bwe,cwe->bc", emb[:, l:l + W, :], conv_w[:, 0])
         for l in range(L)], axis=2) + conv_b[None, :, None]    # (B, C, L)
    pooled = jnp.max(jnp.maximum(fm, 0.0), axis=2)              # (B, C)
    return pooled @ fc_w.T + fc_b[None, :]


def init_params(key, vocab_size, embedding_dim, out_channels, window_size,
                output_dim):
    """Torch-layout parameters with PyTorch default initializers."""
    k_emb, k_cw, k_cb, k_fw, k_fb = jax.random.split(key, 5)

    # nn.Embedding: N(0,1), padding_idx=0 row zeroed.
    emb_table = jax.random.normal(k_emb, (vocab_size, embedding_dim),
                                  jnp.float32)
    emb_table = emb_table.at[0].set(0.0)

    # nn.Conv2d(1, C, (W, E)): U(-b, b), b = 1/sqrt(W*E).
    bc = (window_size * embedding_dim) ** -0.5
    conv_w = jax.random.uniform(
        k_cw, (out_channels, 1, window_size, embedding_dim), jnp.float32,
        minval=-bc, maxval=bc)
    conv_b = jax.random.uniform(k_cb, (out_channels,), jnp.float32,
                                minval=-bc, maxval=bc)

    # nn.Linear(C, O): U(-b, b), b = 1/sqrt(C).
    bf = out_channels ** -0.5
    fc_w = jax.random.uniform(k_fw, (output_dim, out_channels), jnp.float32,
                              minval=-bf, maxval=bf)
    fc_b = jax.random.uniform(k_fb, (output_dim,), jnp.float32,
                              minval=-bf, maxval=bf)
    return emb_table, conv_w, conv_b, fc_w, fc_b


if __name__ == "__main__":
    vocab_size = 50
    embedding_dim = 32
    out_channels = 16
    window_size = 3
    output_dim = 4
    batch = 2
    seq_len = 8

    key = jax.random.PRNGKey(0)
    k_params, k_tokens = jax.random.split(key)

    params = init_params(k_params, vocab_size, embedding_dim, out_channels,
                         window_size, output_dim)
    token_ids = jax.random.randint(k_tokens, (batch, seq_len), 0, vocab_size,
                                   dtype=jnp.int32)

    preds = cnn_forward(token_ids, *params)
    jax.block_until_ready(preds)

    assert preds.shape == (batch, output_dim)
    assert preds.dtype == jnp.float32

    ref = cnn_reference(token_ids, *params)
    max_err = float(jnp.max(jnp.abs(preds - ref)))
    assert max_err < 1e-1, f"mismatch vs pure-JAX reference: {max_err}"

    print("KERNEL_OK")
</pallas_src>

<mosaic_0001>
module attributes {stable_mosaic.version = 11 : i64} {
  func.func @_cnn_kernel(%arg0: i32, %arg1: memref<8x8x128xbf16, #tpu.memory_space<vmem>>, %arg2: memref<384x128xbf16, #tpu.memory_space<vmem>>, %arg3: memref<1x128xf32, #tpu.memory_space<vmem>>, %arg4: memref<128x128xbf16, #tpu.memory_space<vmem>>, %arg5: memref<1x128xf32, #tpu.memory_space<vmem>>, %arg6: memref<8x128xf32, #tpu.memory_space<vmem>>) attributes {dimension_semantics = [#tpu.dimension_semantics<parallel>], iteration_bounds = array<i64: 1>, scalar_prefetch = 0 : i64, scratch_operands = 0 : i64, tpu.core_type = #tpu.core_type<tc>, window_params = [{transform_indices = @transform_0, window_bounds = array<i64: 8, 8, 128>}, {pipeline_mode = #tpu.pipeline_mode<synchronous>, transform_indices = @transform_1, window_bounds = array<i64: 384, 128>}, {pipeline_mode = #tpu.pipeline_mode<synchronous>, transform_indices = @transform_2, window_bounds = array<i64: 1, 128>}, {pipeline_mode = #tpu.pipeline_mode<synchronous>, transform_indices = @transform_3, window_bounds = array<i64: 128, 128>}, {pipeline_mode = #tpu.pipeline_mode<synchronous>, transform_indices = @transform_4, window_bounds = array<i64: 1, 128>}, {transform_indices = @transform_5, window_bounds = array<i64: 8, 128>}]} {
    %c0 = arith.constant 0 : index
    %c0_0 = arith.constant 0 : index
    %c0_1 = arith.constant 0 : index
    %0 = vector.load %arg1[%c0, %c0_0, %c0_1] : memref<8x8x128xbf16, #tpu.memory_space<vmem>>, vector<8x8x128xbf16>
    %1 = arith.extf %0 : vector<8x8x128xbf16> to vector<8x8x128xf32>
    %2 = vector.shape_cast %1 : vector<8x8x128xf32> to vector<64x128xf32>
    %c63_i32 = arith.constant 63 : i32
    %3 = tpu.dynamic_rotate %2 by %c63_i32 dim 0 : vector<64x128xf32>, i32 -> vector<64x128xf32>
    %c62_i32 = arith.constant 62 : i32
    %4 = tpu.dynamic_rotate %2 by %c62_i32 dim 0 : vector<64x128xf32>, i32 -> vector<64x128xf32>
    %5 = tpu.concatenate %2, %3, %4 in 1 : vector<64x128xf32>, vector<64x128xf32>, vector<64x128xf32> -> vector<64x384xf32>
    %6 = arith.truncf %5 : vector<64x384xf32> to vector<64x384xbf16>
    %c0_2 = arith.constant 0 : index
    %c0_3 = arith.constant 0 : index
    %7 = vector.load %arg2[%c0_2, %c0_3] : memref<384x128xbf16, #tpu.memory_space<vmem>>, vector<384x128xbf16>
    %cst = arith.constant dense<0.000000e+00> : vector<64x128xf32>
    %8 = tpu.matmul %6, %7, %cst {dimension_numbers = #tpu.dot_dimension_numbers<[1], [0], [0], [1], [0, 0, 1, 1], [], []>} : vector<64x384xbf16>, vector<384x128xbf16>, vector<64x128xf32> -> vector<64x128xf32>
    %c0_4 = arith.constant 0 : index
    %c0_5 = arith.constant 0 : index
    %9 = vector.load %arg3[%c0_4, %c0_5] : memref<1x128xf32, #tpu.memory_space<vmem>>, vector<1x128xf32>
    %10 = vector.broadcast %9 : vector<1x128xf32> to vector<64x128xf32>
    %11 = arith.addf %8, %10 : vector<64x128xf32>
    %cst_6 = arith.constant 0.000000e+00 : f32
    %12 = vector.broadcast %cst_6 : f32 to vector<64x128xf32>
    %13 = arith.maximumf %11, %12 : vector<64x128xf32>
    %14 = vector.shape_cast %13 : vector<64x128xf32> to vector<8x8x128xf32>
    %15 = tpu.iota {dimensions = array<i32: 1>} : vector<8x8x128xi32>
    %c6_i32 = arith.constant 6 : i32
    %16 = vector.broadcast %c6_i32 : i32 to vector<8x8x128xi32>
    %17 = arith.cmpi slt, %15, %16 : vector<8x8x128xi32>
    %cst_7 = arith.constant 0.000000e+00 : f32
    %18 = vector.broadcast %cst_7 : f32 to vector<8x8x128xf32>
    %19 = arith.select %17, %14, %18 : vector<8x8x128xi1>, vector<8x8x128xf32>
    %cst_8 = arith.constant dense<0xFF800000> : vector<8x128xf32>
    %20 = vector.multi_reduction <maximumf>, %19, %cst_8 [1] : vector<8x8x128xf32> to vector<8x128xf32>
    %21 = arith.truncf %20 : vector<8x128xf32> to vector<8x128xbf16>
    %c0_9 = arith.constant 0 : index
    %c0_10 = arith.constant 0 : index
    %22 = vector.load %arg4[%c0_9, %c0_10] : memref<128x128xbf16, #tpu.memory_space<vmem>>, vector<128x128xbf16>
    %cst_11 = arith.constant dense<0.000000e+00> : vector<8x128xf32>
    %23 = tpu.matmul %21, %22, %cst_11 {dimension_numbers = #tpu.dot_dimension_numbers<[1], [0], [0], [1], [0, 0, 1, 1], [], []>} : vector<8x128xbf16>, vector<128x128xbf16>, vector<8x128xf32> -> vector<8x128xf32>
    %c0_12 = arith.constant 0 : index
    %c0_13 = arith.constant 0 : index
    %24 = vector.load %arg5[%c0_12, %c0_13] : memref<1x128xf32, #tpu.memory_space<vmem>>, vector<1x128xf32>
    %25 = vector.broadcast %24 : vector<1x128xf32> to vector<8x128xf32>
    %26 = arith.addf %23, %25 : vector<8x128xf32>
    %c0_14 = arith.constant 0 : index
    %c0_15 = arith.constant 0 : index
    %27 = vector.load %arg6[%c0_14, %c0_15] : memref<8x128xf32, #tpu.memory_space<vmem>>, vector<8x128xf32>
    tpu.vector_store %arg6[%c0_14, %c0_15], %26 {strides = array<i32>} : memref<8x128xf32, #tpu.memory_space<vmem>>, vector<8x128xf32>,
    return
  }
  func.func @transform_0(%arg0: i32) -> (i32, i32, i32) {
    %c0_i32 = arith.constant 0 : i32
    %c0_i32_0 = arith.constant 0 : i32
    %c0_i32_1 = arith.constant 0 : i32
    return %arg0, %c0_i32, %c0_i32_0 : i32, i32, i32
  }
  func.func @transform_1(%arg0: i32) -> (i32, i32) {
    %c0_i32 = arith.constant 0 : i32
    %c0_i32_0 = arith.constant 0 : i32
    %c0_i32_1 = arith.constant 0 : i32
    return %c0_i32, %c0_i32_0 : i32, i32
  }
  func.func @transform_2(%arg0: i32) -> (i32, i32) {
    %c0_i32 = arith.constant 0 : i32
    %c0_i32_0 = arith.constant 0 : i32
    %c0_i32_1 = arith.constant 0 : i32
    return %c0_i32, %c0_i32_0 : i32, i32
  }
  func.func @transform_3(%arg0: i32) -> (i32, i32) {
    %c0_i32 = arith.constant 0 : i32
    %c0_i32_0 = arith.constant 0 : i32
    %c0_i32_1 = arith.constant 0 : i32
    return %c0_i32, %c0_i32_0 : i32, i32
  }
  func.func @transform_4(%arg0: i32) -> (i32, i32) {
    %c0_i32 = arith.constant 0 : i32
    %c0_i32_0 = arith.constant 0 : i32
    %c0_i32_1 = arith.constant 0 : i32
    return %c0_i32, %c0_i32_0 : i32, i32
  }
  func.func @transform_5(%arg0: i32) -> (i32, i32) {
    %c0_i32 = arith.constant 0 : i32
    %c0_i32_0 = arith.constant 0 : i32
    return %arg0, %c0_i32 : i32, i32
  }
}

</mosaic_0001>

<bundles_post_ra>
// kernel: tpu_custom_call.1
= control target key start
LH: loop header
LB: loop body
LE: loop exit
PB: predicated region body
PF: predicated region fallthrough
CT: control target
= control target key end

     0   :  { %10 = vsyncpa [#allocation3], 0  ;;  %s1093_s0 = inlined_call_operand.hbm [shape: bf16[8,8,128], index: 0, kind: input, shape index: {}]   ;;  %s1094_s1 = inlined_call_operand.hbm [shape: bf16[384,128], index: 1, kind: input, shape index: {}]   ;;  %s1095_s2 = inlined_call_operand.vmem [shape: f32[1,128], index: 2, kind: input, shape index: {}]   ;;  %s1096_s3 = inlined_call_operand.hbm [shape: bf16[128,128], index: 3, kind: input, shape index: {}]   ;;  %s1097_s4 = inlined_call_operand.vmem [shape: f32[1,128], index: 4, kind: input, shape index: {}]   ;;  %s1098_s5 = inlined_call_operand.hbm [shape: f32[8,128], index: 5, kind: output, shape index: {}]  }
   0x1   :  { %11 = vsyncpa [#allocation6], 0 }
   0x2   :  { %12 = vsyncpa [#allocation4], 0  ;;  %s965_s18 = smov [#allocation5]   ;;  %s966_s20 = smov [#allocation2]  }
   0x3   :  { %s30_s19 = sshll.u32 %s965_s18, 4  ;;  %s18_s21 = sshll.u32 %s966_s20, 4  ;;  %s31_s19 = int_to_ptr.vmem [resolvable:$true] %s30_s19  ;;  %s19_s21 = int_to_ptr.vmem [resolvable:$true] %s18_s21 }
   0x4   :  { %s887_s22 = scalar_lea.vmem %s31_s19, 3072  ;;  %p892_p1 = scmp.lt.s32.totalorder %s31_s19, %s31_s19 }
   0x5   :  { %p888_p0 = scmp.ne.s32.totalorder %s31_s19, %s887_s22  ;;  %p893_p2 = scmp.lt.s32.totalorder %s887_s22, %s887_s22 }
   0x7   :  { %p894_p3 = por %p893_p2, %p892_p1 }
   0x9   :  { %p895_p4 = pnand %p894_p3, %p888_p0 }
   0xb   :  { %898 = shalt.err (!%p895_p4)
}
   0xc   :  { %s967_s23 = smov 64   ;;  %s968_s24 = smov 4  }
   0xd   :  { %36 = dma.hbm_to_vmem [thread:$0]  %s1094_s1, 3072, %s31_s19, [#allocation6], %s967_s23, %s967_s23, %s968_s24  }
   0xe   :  { %s907_s27 = scalar_lea.vmem %s19_s21, 512  ;;  %p912_p6 = scmp.lt.s32.totalorder %s19_s21, %s19_s21 }
   0xf   :  { %p908_p5 = scmp.ne.s32.totalorder %s19_s21, %s907_s27  ;;  %p913_p7 = scmp.lt.s32.totalorder %s907_s27, %s907_s27 }
  0x11   :  { %p914_p8 = por %p913_p7, %p912_p6 }
  0x13   :  { %p915_p9 = pnand %p914_p8, %p908_p5 }
  0x15   :  { %918 = shalt.err (!%p915_p9)
}
  0x16   :  { %24 = dma.hbm_to_vmem [thread:$0]  %s1093_s0, 512, %s19_s21, [#allocation3], %s967_s23, %s967_s23, %s968_s24  }
  0x17   :  { %s969_s30 = smov [#allocation7]  }
  0x18   :  { %s44_s6 = sshll.u32 %s969_s30, 4  ;;  %s45_s6 = int_to_ptr.vmem [resolvable:$true] %s44_s6 }
  0x19   :  { %s927_s7 = scalar_lea.vmem %s45_s6, 1024  ;;  %p932_p11 = scmp.lt.s32.totalorder %s45_s6, %s45_s6 }
  0x1a   :  { %p928_p10 = scmp.ne.s32.totalorder %s45_s6, %s927_s7  ;;  %p933_p12 = scmp.lt.s32.totalorder %s927_s7, %s927_s7 }
  0x1c   :  { %p934_p13 = por %p933_p12, %p932_p11 }
  0x1e   :  { %p935_p0 = pnand %p934_p13, %p928_p10 }
  0x20   :  { %938 = shalt.err (!%p935_p0)
}
  0x21   :  { %50 = dma.hbm_to_vmem [thread:$0]  %s1096_s3, 1024, %s45_s6, [#allocation6], %s967_s23, %s967_s23, %s968_s24  }
  0x22   :  { %959 = dma.done.wait [#allocation3], 512  }
  0x23   :  { %960 = vsyncadd [#allocation3], 4294966784 }
  0x24   :  { %961 = dma.done.wait [#allocation6], 4096  }
  0x25   :  { %962 = vsyncadd [#allocation6], 4294963200  ;;  %v839_v0 = vld [vmem:[#allocation5 + $0x78] sm:$0xff]   ;;  %v841_v2 = vld [vmem:[#allocation5 + $0x70] sm:$0xff]   ;;  %v87_v15 = vlaneseq  ;;  %vm971_vm2 = vmmov 0   ;;  %vm567_vm3 = vcmask 1041409  }
  0x26   :  { %v840_v1 = vld [vmem:[#allocation5 + $0x38] sm:$0xff]   ;;  %726 = vmatprep.subr.bf16.mxu0 %v839_v0  ;;  %v843_v4 = vld [vmem:[#allocation5 + $0x30] sm:$0xff]   ;;  %v844_v5 = vld [vmem:[#allocation5 + $0x68] sm:$0xff]   ;;  %vm569_vm4 = vcmask 1042434   ;;  %vm571_vm5 = vcmask 1043459   ;;  %vm573_vm6 = vcmask 1044484  }
  0x27   :  { %727 = vmatpush3.bf16.msra.mxu0 %v840_v1  ;;  %v842_v3 = vld [vmem:[#allocation5 + $0xb8] sm:$0xff]   ;;  %v845_v6 = vld [vmem:[#allocation5 + $0xb0] sm:$0xff]   ;;  %v846_v7 = vld [vmem:[#allocation5 + $0x28] sm:$0xff]   ;;  %v1012_v19 = vshrl.u32 %v87_v15, 7  ;;  %v970_v15 = vmov 0.0   ;;  %vm575_vm7 = vcmask 1045509  }
  0x28   :  { %728 = vmatprep.subr.bf16.mxu0 %v841_v2  ;;  %787 = vmatprep.subr.bf16.mxu1 %v842_v3  ;;  %v847_v8 = vld [vmem:[#allocation5 + $0x60] sm:$0xff]   ;;  %v848_v9 = vld [vmem:[#allocation5 + $0xa8] sm:$0xff]   ;;  %v850_v11 = vld [vmem:[#allocation5 + $0x58] sm:$0xff]   ;;  %vm577_vm8 = vcmask 1046534   ;;  %vm579_vm9 = vcmask 1047559   ;;  %s972_s10 = smov [#allocation8]  }
  0x29   :  { %788 = vmatpush3.bf16.msra.mxu1 %v842_v3  ;;  %v849_v10 = vld [vmem:[#allocation5 + $0x20] sm:$0xff]   ;;  %v852_v13 = vld [vmem:[#allocation5 + $0x18] sm:$0xff]   ;;  %v853_v16 = vld [vmem:[#allocation5 + $0x50] sm:$0xff]   ;;  %vm89_vm0 = vcmp.lt.s32.totalorder %v1012_v19, 7  ;;  %vm106_vm1 = vcmp.lt.s32.totalorder %v1012_v19, 6  ;;  %s678_s11 = sshll.u32 %s972_s10, 4  ;;  %s679_s11 = int_to_ptr.vmem [resolvable:$true] %s678_s11 }
  0x2a   :  { %789 = vmatprep.subr.bf16.mxu1 %v845_v6  ;;  %v851_v12 = vld [vmem:[#allocation5 + $0xa0] sm:$0xff]   ;;  %v854_v14 = vld [vmem:[#allocation5 + $0x98] sm:$0xff]   ;;  %v855_v17 = vld [vmem:[#allocation5 + $0x10] sm:$0xff]   ;;  %s939_s12 = scalar_lea.vmem %s679_s11, 128  ;;  %p944_p2 = scmp.lt.s32.totalorder %s679_s11, %s679_s11 }
  0x2b   :  { %729 = vmatpush3.bf16.msra.mxu0 %v843_v4  ;;  %v857_v18 = vld [vmem:[#allocation5 + $0x90] sm:$0xff]   ;;  %v856_v20 = vld [vmem:[#allocation5 + $0x48] sm:$0xff]   ;;  %v63_v23 = vld [vmem:[#allocation2] sm:$0xff]   ;;  %p940_p1 = scmp.ne.s32.totalorder %s679_s11, %s939_s12  ;;  %p945_p3 = scmp.lt.s32.totalorder %s939_s12, %s939_s12 }
  0x2c   :  { %730 = vmatprep.subr.bf16.mxu0 %v844_v5  ;;  %v858_v21 = vld [vmem:[#allocation5 + $0x8] sm:$0xff]   ;;  %v859_v25 = vld [vmem:[#allocation5 + $0x40] sm:$0xff]   ;;  %v71_v26 = vunpack.c.l.bf16 %v63_v23  ;;  %v72_v27 = vunpack.c.h.bf16 %v63_v23  ;;  %v1019_v29 = vld [vmem:[#allocation2 + $0x10] sm:$0xff]  }
  0x2d   :  { %790 = vmatpush3.bf16.msra.mxu1 %v845_v6  ;;  %v860_v22 = vld [vmem:[#allocation5 + $0x88] sm:$0xff]   ;;  %v861_v30 = vld [vmem:[#allocation5] sm:$0xff]   ;;  %v75_v32 = vunpack.c.l.bf16 %v1019_v29  ;;  %v76_v33 = vunpack.c.h.bf16 %v1019_v29  ;;  %v69_v39 = vld [vmem:[#allocation2 + $0x18] sm:$0xff]   ;;  %p946_p4 = por %p945_p3, %p944_p2 }
  0x2e   :  { %791 = vmatprep.subr.bf16.mxu1 %v848_v9  ;;  %v1014_v24 = vld [vmem:[#allocation2 + $0x8] sm:$0xff]   ;;  %v79_v34 = vrot.slane %v71_v26, 1  ;;  %v80_v35 = vrot.slane %v72_v27, 1  ;;  %v863_v37 = vld [vmem:[#allocation5 + $0x80] sm:$0xff]   ;;  %v98_v38 = vrot.slane %v71_v26, 2  ;;  %v99_v40 = vrot.slane %v72_v27, 2 }
  0x2f   :  { %731 = vmatpush3.bf16.msra.mxu0 %v846_v7  ;;  %v73_v28 = vunpack.c.l.bf16 %v1014_v24  ;;  %v74_v31 = vunpack.c.h.bf16 %v1014_v24  ;;  %v102_v43 = vrot.slane %v75_v32, 2  ;;  %v83_v47 = vrot.slane %v75_v32, 1  ;;  %v1061_v26 = vld [vmem:[%s1095_s2] ss:$0 sm:$0xff]  ;;  %p947_p5 = pnand %p946_p4, %p940_p1 }
  0x30   :  { %732 = vmatprep.subr.bf16.mxu0 %v847_v8  ;;  %v96_v45 = vsel %vm89_vm0, %v79_v34, %v80_v35  ;;  %v113_v50 = vsel %vm106_vm1, %v98_v38, %v99_v40  ;;  %v77_v57 = vunpack.c.l.bf16 %v69_v39  ;;  %v84_v58 = vrot.slane %v76_v33, 1 }
  0x31   :  { %792 = vmatpush3.bf16.msra.mxu1 %v848_v9  ;;  %v81_v36 = vrot.slane %v73_v28, 1  ;;  %v100_v41 = vrot.slane %v73_v28, 2  ;;  %v101_v42 = vrot.slane %v74_v31, 2  ;;  %v82_v46 = vrot.slane %v74_v31, 1 }
  0x32   :  { %793 = vmatprep.subr.bf16.mxu1 %v851_v12  ;;  %v103_v59 = vrot.slane %v76_v33, 2  ;;  %v78_v60 = vunpack.c.h.bf16 %v69_v39  ;;  %v85_v62 = vrot.slane %v77_v57, 1  ;;  %v104_v63 = vrot.slane %v77_v57, 2 }
  0x33   :  { %733 = vmatpush3.bf16.msra.mxu0 %v849_v10  ;;  %v95_v44 = vsel %vm89_vm0, %v80_v35, %v81_v36  ;;  %v112_v49 = vsel %vm106_vm1, %v99_v40, %v100_v41  ;;  %v110_v51 = vsel %vm106_vm1, %v101_v42, %v102_v43  ;;  %v111_v53 = vsel %vm106_vm1, %v100_v41, %v101_v42 }
  0x34   :  { %734 = vmatprep.subr.bf16.mxu0 %v850_v11  ;;  %v116_v48 = vpack.c.bf16 %v95_v44, %v96_v45  ;;  %v117_v52 = vpack.c.bf16 %v112_v49, %v113_v50  ;;  %v93_v54 = vsel %vm89_vm0, %v82_v46, %v83_v47  ;;  %v94_v55 = vsel %vm89_vm0, %v81_v36, %v82_v46 }
  0x35   :  { %794 = vmatpush3.bf16.msra.mxu1 %v851_v12  ;;  %v119_v56 = vpack.c.bf16 %v93_v54, %v94_v55  ;;  %v120_v61 = vpack.c.bf16 %v110_v51, %v111_v53  ;;  %v109_v0 = vsel %vm106_vm1, %v102_v43, %v103_v59  ;;  %v105_v1 = vrot.slane %v78_v60, 2 }
  0x36   :  { %795 = vmatprep.subr.bf16.mxu1 %v854_v14  ;;  %358 = vmatprep.mubr.bf16.mxu0 %v116_v48  ;;  %v108_v2 = vsel %vm106_vm1, %v103_v59, %v104_v63  ;;  %v91_v3 = vsel %vm89_vm0, %v84_v58, %v85_v62  ;;  %v92_v4 = vsel %vm89_vm0, %v83_v47, %v84_v58  ;;  %v86_v9 = vrot.slane %v78_v60, 1 }
  0x37   :  { %735 = vmatpush3.bf16.msra.mxu0 %v852_v13  ;;  %803 = vmatprep.mubr.bf16.mxu1 %v117_v52  ;;  %v123_v5 = vpack.c.bf16 %v108_v2, %v109_v0  ;;  %v107_v6 = vsel %vm106_vm1, %v104_v63, %v105_v1  ;;  %v114_v7 = vsel %vm106_vm1, %v105_v1, %v98_v38 }
  0x38   :  { %736 = vmatprep.subr.bf16.mxu0 %v853_v16  ;;  %v122_v8 = vpack.c.bf16 %v91_v3, %v92_v4  ;;  %v126_v10 = vpack.c.bf16 %v114_v7, %v107_v6  ;;  %v90_v11 = vsel %vm89_vm0, %v85_v62, %v86_v9  ;;  %v97_v12 = vsel %vm89_vm0, %v86_v9, %v79_v34  ;;  %v868_v16 = vld [vmem:[#allocation7 + $0x30] sm:$0xff]  }
  0x39   :  { %796 = vmatpush3.bf16.msra.mxu1 %v854_v14  ;;  %v125_v13 = vpack.c.bf16 %v97_v12, %v90_v11  ;;  %v867_v14 = vld [vmem:[#allocation7 + $0x38] sm:$0xff]  }
  0x3a   :  { %797 = vmatprep.subr.bf16.mxu1 %v857_v18 }
  0x3b   :  { %737 = vmatpush3.bf16.msra.mxu0 %v855_v17  ;;  %v869_v17 = vld [vmem:[#allocation7 + $0x28] sm:$0xff]  }
  0x3c   :  { %738 = vmatprep.subr.bf16.mxu0 %v856_v20  ;;  %v871_v20 = vld [vmem:[#allocation7 + $0x18] sm:$0xff]  }
  0x3d   :  { %798 = vmatpush3.bf16.msra.mxu1 %v857_v18  ;;  %v870_v18 = vld [vmem:[#allocation7 + $0x20] sm:$0xff]  }
  0x3e   :  { %799 = vmatprep.subr.bf16.mxu1 %v860_v22 }
  0x3f   :  { %739 = vmatpush3.bf16.msra.mxu0 %v858_v21  ;;  %v872_v21 = vld [vmem:[#allocation7 + $0x10] sm:$0xff]  }
  0x40   :  { %740 = vmatprep.subr.bf16.mxu0 %v859_v25 }
  0x41   :  { %800 = vmatpush3.bf16.msra.mxu1 %v860_v22  ;;  %v873_v22 = vld [vmem:[#allocation7 + $0x8] sm:$0xff]  }
  0x42   :  { %801 = vmatprep.subr.bf16.mxu1 %v863_v37 }
  0x43   :  { %741 = vmatpush3.bf16.msra.mxu0 %v861_v30 }
  0x44   :  { %811 = vmatprep.subr.bf16.mxu0 %v970_v15 }
  0x45   :  { %802 = vmatpush3.bf16.msra.mxu1 %v863_v37 }
  0x46   :  { %359 = vmatmul.mubr.bf16.vlgmr.msra.gmra.mxu0 %v63_v23  ;;  %v874_v23 = vld [vmem:[#allocation7] sm:$0xff]  }
  0x47   :  { %366 = vmatprep.mubr.bf16.mxu0 %v119_v56  ;;  %812 = vmatpush3.bf16.msra.mxu0 %v867_v14 }
  0x48   :  { %804 = vmatmul.mubr.bf16.vlgmr.msra.gmra.mxu1 %v120_v61  ;;  %813 = vmatprep.subr.bf16.mxu0 %v970_v15 }
  0x49   :  { %807 = vmatprep.mubr.bf16.mxu1 %v123_v5 }
  0x4b   :  { %814 = vmatpush3.bf16.msra.mxu0 %v868_v16 }
  0x4c   :  { %815 = vmatprep.subr.bf16.mxu0 %v970_v15 }
  0x4e   :  { %367 = vmatmul.mubr.bf16.gmra.mxu0 %v1014_v24 }
  0x4f   :  { %374 = vmatprep.mubr.bf16.mxu0 %v122_v8  ;;  %816 = vmatpush3.bf16.msra.mxu0 %v869_v17 }
  0x50   :  { %808 = vmatmul.mubr.bf16.gmra.mxu1 %v126_v10  ;;  %817 = vmatprep.subr.bf16.mxu0 %v970_v15 }
  0x53   :  { %818 = vmatpush3.bf16.msra.mxu0 %v870_v18 }
  0x54   :  { %819 = vmatprep.subr.bf16.mxu0 %v970_v15 }
  0x56   :  { %375 = vmatmul.mubr.bf16.gmra.mxu0 %v1019_v29 }
  0x57   :  { %382 = vmatprep.mubr.bf16.mxu0 %v125_v13  ;;  %820 = vmatpush3.bf16.msra.mxu0 %v871_v20 }
  0x58   :  { %821 = vmatprep.subr.bf16.mxu0 %v970_v15 }
  0x5b   :  { %822 = vmatpush3.bf16.msra.mxu0 %v872_v21 }
  0x5c   :  { %823 = vmatprep.subr.bf16.mxu0 %v970_v15 }
  0x5e   :  { %383 = vmatmul.mubr.bf16.gmra.mxu0 %v69_v39 }
  0x5f   :  { %824 = vmatpush3.bf16.msra.mxu0 %v873_v22  ;;  %827 = vmatprep.mubr.msk.bf16.mxu0 %vm971_vm2, %v970_v15 }
  0x60   :  { %825 = vmatprep.subr.bf16.mxu0 %v970_v15 }
  0x63   :  { %826 = vmatpush3.bf16.msra.mxu0 %v874_v23 }
 0x106   :  { %v742_v24 = vpop.f32.mrf.mxu0 }
 0x108   :  { %v743_v25 = vpop.f32.mrf.mxu0  ;;  %v805_v28 = vpop.f32.mrf.mxu1 }
 0x109   :  { %v744_v27 = vadd.f32 %v743_v25, %v742_v24 }
 0x10a   :  { %v745_v29 = vpop.f32.mrf.mxu0  ;;  %v425_v31 = vpop.f32.mrf.mxu1 }
 0x10b   :  { %v361_v30 = vadd.f32 %v744_v27, %v1061_v26 }
 0x10c   :  { %v746_v32 = vpop.f32.mrf.mxu0  ;;  %v806_v34 = vpop.f32.mrf.mxu1 }
 0x10d   :  { %v747_v33 = vadd.f32 %v746_v32, %v745_v29  ;;  %v426_v36 = vadd.f32 %v425_v31, %v361_v30 }
 0x10e   :  { %v748_v35 = vpop.f32.mrf.mxu0  ;;  %v428_v38 = vpop.f32.mrf.mxu1 }
 0x10f   :  { %v364_v37 = vadd.f32 %v747_v33, %v1061_v26  ;;  %v456_v44 = vmax.f32 %v426_v36, 0.0 }
 0x110   :  { %v749_v39 = vpop.f32.mrf.mxu0  ;;  %v809_v43 = vpop.f32.mrf.mxu1 }
 0x111   :  { %v750_v40 = vadd.f32 %v749_v39, %v748_v35  ;;  %v429_v41 = vadd.f32 %v428_v38, %v364_v37  ;;  %v464_v53 = vsel %vm106_vm1, %v456_v44, 0.0 }
 0x112   :  { %v751_v42 = vpop.f32.mrf.mxu0  ;;  %v441_v52 = vpop.f32.mrf.mxu1  ;;  %v472_v61 = vrot.slane %v464_v53, 4 }
 0x113   :  { %v369_v45 = vadd.f32 %v750_v40, %v1061_v26  ;;  %v457_v46 = vmax.f32 %v429_v41, 0.0 }
 0x114   :  { %v752_v47 = vpop.f32.mrf.mxu0  ;;  %v810_v0 = vpop.f32.mrf.mxu1  ;;  %v473_v9 = vmax.f32 %v464_v53, %v472_v61 }
 0x115   :  { %v434_v48 = vadd.f32 %v805_v28, %v369_v45  ;;  %v465_v49 = vsel %vm106_vm1, %v457_v46, 0.0  ;;  %v753_v50 = vadd.f32 %v752_v47, %v751_v42 }
 0x116   :  { %v754_v51 = vpop.f32.mrf.mxu0  ;;  %v478_v56 = vrot.slane %v465_v49, 4  ;;  %v444_v12 = vpop.f32.mrf.mxu1  ;;  %v474_v23 = vrot.slane %v473_v9, 2 }
 0x117   :  { %v458_v54 = vmax.f32 %v434_v48, 0.0  ;;  %v372_v55 = vadd.f32 %v753_v50, %v1061_v26 }
 0x118   :  { %v755_v57 = vpop.f32.mrf.mxu0  ;;  %v479_v3 = vmax.f32 %v465_v49, %v478_v56  ;;  %v475_v37 = vmax.f32 %v473_v9, %v474_v23 }
 0x119   :  { %v466_v58 = vsel %vm106_vm1, %v458_v54, 0.0  ;;  %v437_v59 = vadd.f32 %v806_v34, %v372_v55  ;;  %v756_v60 = vadd.f32 %v755_v57, %v754_v51 }
 0x11a   :  { %v484_v62 = vrot.slane %v466_v58, 4  ;;  %v757_v63 = vpop.f32.mrf.mxu0  ;;  %v480_v15 = vrot.slane %v479_v3, 2 }
 0x11b   :  { %v459_v1 = vmax.f32 %v437_v59, 0.0  ;;  %v377_v2 = vadd.f32 %v756_v60, %v1061_v26 }
 0x11c   :  { %v758_v4 = vpop.f32.mrf.mxu0  ;;  %v485_v5 = vmax.f32 %v466_v58, %v484_v62  ;;  %v481_v30 = vmax.f32 %v479_v3, %v480_v15 }
 0x11d   :  { %v467_v6 = vsel %vm106_vm1, %v459_v1, 0.0  ;;  %v759_v7 = vadd.f32 %v758_v4, %v757_v63  ;;  %v442_v8 = vadd.f32 %v441_v52, %v377_v2 }
 0x11e   :  { %v490_v10 = vrot.slane %v467_v6, 4  ;;  %v760_v11 = vpop.f32.mrf.mxu0  ;;  %v486_v18 = vrot.slane %v485_v5, 2  ;;  %v482_v44 = vrot.slane %v481_v30, 1 }
 0x11f   :  { %v460_v13 = vmax.f32 %v442_v8, 0.0  ;;  %v380_v14 = vadd.f32 %v759_v7, %v1061_v26 }
 0x120   :  { %v491_v16 = vmax.f32 %v467_v6, %v490_v10  ;;  %v761_v17 = vpop.f32.mrf.mxu0  ;;  %v487_v33 = vmax.f32 %v485_v5, %v486_v18  ;;  %v483_v55 = vmax.f32 %v481_v30, %v482_v44 }
 0x121   :  { %v468_v20 = vsel %vm106_vm1, %v460_v13, 0.0  ;;  %v762_v21 = vadd.f32 %v761_v17, %v760_v11  ;;  %v445_v22 = vadd.f32 %v444_v12, %v380_v14 }
 0x122   :  { %v492_v24 = vrot.slane %v491_v16, 2  ;;  %v496_v25 = vrot.slane %v468_v20, 4  ;;  %v763_v27 = vpop.f32.mrf.mxu0  ;;  %v488_v46 = vrot.slane %v487_v33, 1 }
 0x123   :  { %v385_v28 = vadd.f32 %v762_v21, %v1061_v26  ;;  %v461_v29 = vmax.f32 %v445_v22, 0.0 }
 0x124   :  { %v497_v31 = vmax.f32 %v468_v20, %v496_v25  ;;  %v764_v32 = vpop.f32.mrf.mxu0  ;;  %v493_v38 = vmax.f32 %v491_v16, %v492_v24  ;;  %v489_v57 = vmax.f32 %v487_v33, %v488_v46 }
 0x125   :  { %v450_v34 = vadd.f32 %v809_v43, %v385_v28  ;;  %v469_v35 = vsel %vm106_vm1, %v461_v29, 0.0  ;;  %v765_v36 = vadd.f32 %v764_v32, %v763_v27  ;;  %v476_v43 = vrot.slane %v475_v37, 1 }
 0x126   :  { %v498_v39 = vrot.slane %v497_v31, 2  ;;  %v502_v41 = vrot.slane %v469_v35, 4  ;;  %v494_v50 = vrot.slane %v493_v38, 1  ;;  %v522_v4 = vpack.c.bf16 %v489_v57, %v489_v57 }
 0x127   :  { %v462_v40 = vmax.f32 %v450_v34, 0.0  ;;  %v388_v42 = vadd.f32 %v765_v36, %v1061_v26  ;;  %v477_v59 = vmax.f32 %v475_v37, %v476_v43 }
 0x128   :  { %v499_v45 = vmax.f32 %v497_v31, %v498_v39  ;;  %v503_v48 = vmax.f32 %v469_v35, %v502_v41  ;;  %v495_v60 = vmax.f32 %v493_v38, %v494_v50  ;;  %v561_v14 = vunpack.c.l.b16 %v522_v4  ;;  %v717_v35 = vld [vmem:[%s1097_s4] ss:$0 sm:$0xff] }
 0x129   :  { %v470_v47 = vsel %vm106_vm1, %v462_v40, 0.0  ;;  %v453_v49 = vadd.f32 %v810_v0, %v388_v42  ;;  %v521_v0 = vpack.c.bf16 %v483_v55, %v483_v55  ;;  %v520_v6 = vpack.c.bf16 %v477_v59, %v477_v59 }
 0x12a   :  { %v508_v51 = vrot.slane %v470_v47, 4  ;;  %v500_v52 = vrot.slane %v499_v45, 1  ;;  %v504_v53 = vrot.slane %v503_v48, 2  ;;  %v523_v7 = vpack.c.bf16 %v495_v60, %v495_v60 }
 0x12b   :  { %v463_v54 = vmax.f32 %v453_v49, 0.0  ;;  %v560_v11 = vunpack.c.l.b16 %v521_v0  ;;  %v559_v15 = vunpack.c.l.b16 %v520_v6 }
 0x12c   :  { %v509_v56 = vmax.f32 %v470_v47, %v508_v51  ;;  %v505_v58 = vmax.f32 %v503_v48, %v504_v53  ;;  %v501_v63 = vmax.f32 %v499_v45, %v500_v52  ;;  %v562_v16 = vunpack.c.l.b16 %v523_v7 }
 0x12d   :  { %v471_v26 = vsel %vm106_vm1, %v463_v54, 0.0  ;;  %v568_v21 = vsel %vm567_vm3, %v560_v11, %v559_v15 }
 0x12e   :  { %v510_v61 = vrot.slane %v509_v56, 2  ;;  %v514_v62 = vrot.slane %v471_v26, 4  ;;  %v506_v1 = vrot.slane %v505_v58, 1  ;;  %v524_v10 = vpack.c.bf16 %v501_v63, %v501_v63 }
 0x12f   :  { %v570_v24 = vsel %vm569_vm4, %v561_v14, %v568_v21 }
 0x130   :  { %v511_v2 = vmax.f32 %v509_v56, %v510_v61  ;;  %v515_v3 = vmax.f32 %v471_v26, %v514_v62  ;;  %v507_v5 = vmax.f32 %v505_v58, %v506_v1  ;;  %v563_v20 = vunpack.c.l.b16 %v524_v10 }
 0x131   :  { %v572_v27 = vsel %vm571_vm5, %v562_v16, %v570_v24 }
 0x132   :  { %v512_v8 = vrot.slane %v511_v2, 1  ;;  %v516_v9 = vrot.slane %v515_v3, 2  ;;  %v525_v19 = vpack.c.bf16 %v507_v5, %v507_v5  ;;  %v574_v29 = vsel %vm573_vm6, %v563_v20, %v572_v27 }
 0x134   :  { %v513_v12 = vmax.f32 %v511_v2, %v512_v8  ;;  %v517_v13 = vmax.f32 %v515_v3, %v516_v9  ;;  %v564_v22 = vunpack.c.l.b16 %v525_v19 }
 0x136   :  { %v526_v17 = vpack.c.bf16 %v513_v12, %v513_v12  ;;  %v518_v18 = vrot.slane %v517_v13, 1  ;;  %v576_v30 = vsel %vm575_vm7, %v564_v22, %v574_v29 }
 0x138   :  { %v519_v23 = vmax.f32 %v517_v13, %v518_v18  ;;  %v565_v25 = vunpack.c.l.b16 %v526_v17 }
 0x13a   :  { %v527_v28 = vpack.c.bf16 %v519_v23, %v519_v23  ;;  %v578_v32 = vsel %vm577_vm8, %v565_v25, %v576_v30 }
 0x13c   :  { %v566_v31 = vunpack.c.l.b16 %v527_v28 }
 0x13e   :  { %v580_v33 = vsel %vm579_vm9, %v566_v31, %v578_v32 }
 0x13f   :  { %v581_v34 = vpack.c.b16 %v580_v33, %v580_v33 }
 0x141   :  { %828 = vmatmul.mubr.bf16.vlgmr.msra.gmra.mxu0 %v581_v34 }
 0x201   :  { %v665_v36 = vpop.f32.mrf.mxu0 }
 0x202   :  { %v666_v37 = vadd.f32 %v717_v35, %v665_v36 }
 0x203   :  { %v829_v38 = vpop.f32.mrf.mxu0 }
 0x204   :  { %671 = vst [vmem:[#allocation8] sm:$0xff] %v666_v37 }
 0x205   :  { %v668_v39 = vpop.f32.mrf.mxu0 }
 0x206   :  { %950 = shalt.err (!%p947_p5)
}
 0x207   :  { %681 = dma.vmem_to_hbm [thread:$0]  %s679_s11, 128, %s1098_s5, [#allocation4]   ;;  %v830_v40 = vpop.f32.mrf.mxu0 }
 0x208   :  { %963 = dma.done.wait [#allocation4], 128  }
 0x209   :  { %964 = vsyncadd [#allocation4], 4294967168 }
 0x20a   :  { %685 = vsyncpa [#allocation3], 1 }
 0x20b   :  { %686 = vsyncpa [#allocation6], 1 }
 0x20c   :  { %687 = vsyncpa [#allocation4], 1 }

</bundles_post_ra>
